<compile_context>
chip_gen: v6e
topology: v6e:2x2x1
jax: 0.10.0
libtpu: 0.0.40
codegen_flags: <defaults>
</compile_context>

<pallas_src>
import jax
import jax.numpy as jnp
from jax.experimental import pallas as pl
from jax.experimental.pallas import tpu as pltpu


def _round_up(n, m):
    return ((n + m - 1) // m) * m


def phrase_cnn_kernel(x_ref, xp_ref, xn_ref,
                      wx_ref, wp_ref, wn_ref, b_ref,
                      o_ref):
    """One row-tile: three fused matmuls + packed bias + branch max."""
    Hp = o_ref.shape[-1]                      # padded hidden size (multiple of 128)

    # (TM, Hp) @ (Hp, {3Hp, 2Hp, Hp}) on the MXU, f32 accumulation.
    y = jnp.dot(x_ref[...], wx_ref[...],
                preferred_element_type=jnp.float32) + b_ref[...]     # (TM, 3Hp)
    yp = jnp.dot(xp_ref[...], wp_ref[...],
                 preferred_element_type=jnp.float32)                 # (TM, 2Hp)
    yn = jnp.dot(xn_ref[...], wn_ref[...],
                 preferred_element_type=jnp.float32)                 # (TM, Hp)

    uni = y[:, 0 * Hp:1 * Hp]
    big = y[:, 1 * Hp:2 * Hp] + yp[:, 0 * Hp:1 * Hp]
    tri = y[:, 2 * Hp:3 * Hp] + yp[:, 1 * Hp:2 * Hp] + yn

    o_ref[...] = jnp.maximum(jnp.maximum(uni, big), tri).astype(o_ref.dtype)


def phrase_cnn_pallas(x, params, compute_dtype=None, row_tile=256):
    """x: (B, L, H). params: (w1,b1,w2,b2,w3,b3) in PyTorch Conv1d layout (out,in,k).

    compute_dtype: dtype fed to the MXU (e.g. jnp.bfloat16); accumulation and the
    bias/max epilogue are always f32; output keeps x.dtype.
    """
    B, L, H = x.shape
    w1, b1, w2, b2, w3, b3 = params
    out_dtype = x.dtype
    cdt = x.dtype if compute_dtype is None else compute_dtype

    Hp = _round_up(H, 128)                      # lane-dense hidden size
    M = B * L                                   # batch folded into MXU M dim
    TM = min(int(row_tile), _round_up(M, 8))    # row tile (multiple of 8)
    Mp = _round_up(M, TM)
    assert Mp % TM == 0

    # --- shifted copies with zero padding at sequence boundaries (plain JAX) ---
    zero = jnp.zeros((B, 1, H), x.dtype)
    x_prev = jnp.concatenate([zero, x[:, :-1, :]], axis=1)   # x[t-1]
    x_next = jnp.concatenate([x[:, 1:, :], zero], axis=1)    # x[t+1]

    def prep_rows(a):
        a = a.reshape(M, H).astype(cdt)
        return jnp.pad(a, ((0, Mp - M), (0, Hp - H)))

    xr, xpr, xnr = prep_rows(x), prep_rows(x_prev), prep_rows(x_next)

    # --- fused, padded weights: tap k of conv -> (H_in, H_out), zero-padded to Hp ---
    def tap(w, k):
        t = jnp.asarray(w[:, :, k]).T                      # (in, out)
        return jnp.pad(t, ((0, Hp - H), (0, Hp - H)))

    w_x = jnp.concatenate([tap(w1, 0), tap(w2, 1), tap(w3, 1)], axis=1).astype(cdt)  # (Hp, 3Hp)
    w_prev = jnp.concatenate([tap(w2, 0), tap(w3, 0)], axis=1).astype(cdt)           # (Hp, 2Hp)
    w_next = tap(w3, 2).astype(cdt)                                                  # (Hp, Hp)

    def padb(b):
        return jnp.pad(jnp.asarray(b, jnp.float32), (0, Hp - H))

    b_pack = jnp.concatenate([padb(b1), padb(b2), padb(b3)]).reshape(1, 3 * Hp)      # f32

    grid = (Mp // TM,)
    in_bytes = jnp.dtype(cdt).itemsize
    out_bytes = jnp.dtype(out_dtype).itemsize
    flops = 2 * Mp * Hp * (6 * Hp)              # three matmuls, N = 3H + 2H + H
    bytes_accessed = (3 * Mp * Hp * in_bytes + 6 * Hp * Hp * in_bytes
                      + 3 * Hp * 4 + Mp * Hp * out_bytes)

    def build_call(single_buffer):
        # Weights / bias never change across the row grid -> single-buffer them.
        def const_spec(shape):
            if single_buffer:
                return pl.BlockSpec(shape, lambda i: (0, 0),
                                    pipeline_mode=pl.Buffered(1))
            return pl.BlockSpec(shape, lambda i: (0, 0))

        row_spec = pl.BlockSpec((TM, Hp), lambda i: (i, 0))

        # Rough per-step VMEM residency; only raise the scoped limit if needed.
        wbuf = 1 if single_buffer else 2
        vmem_est = (2 * 3 * TM * Hp * in_bytes          # x / x_prev / x_next (dbl-buffered)
                    + wbuf * 6 * Hp * Hp * in_bytes     # fused weights (6 HxH taps total)
                    + wbuf * 3 * Hp * 4                 # packed bias
                    + 2 * TM * Hp * out_bytes           # output (dbl-buffered)
                    + TM * 6 * Hp * 4)                  # f32 partials y/yp/yn
        vmem_kw = {}
        if vmem_est > 32 * 2 ** 20:
            # Headroom, but stay under v7x's 64 MiB physical VMEM; for larger
            # problems shrink row_tile instead.
            vmem_kw = dict(vmem_limit_bytes=int(min(vmem_est * 5 // 4, 60 * 2 ** 20)))

        return pl.pallas_call(
            phrase_cnn_kernel,
            out_shape=jax.ShapeDtypeStruct((Mp, Hp), out_dtype),
            grid_spec=pltpu.PrefetchScalarGridSpec(
                num_scalar_prefetch=0,
                grid=grid,
                in_specs=[row_spec, row_spec, row_spec,
                          const_spec((Hp, 3 * Hp)),
                          const_spec((Hp, 2 * Hp)),
                          const_spec((Hp, Hp)),
                          const_spec((1, 3 * Hp))],
                out_specs=row_spec,
            ),
            compiler_params=pltpu.CompilerParams(
                dimension_semantics=("parallel",), **vmem_kw),
            cost_estimate=pl.CostEstimate(
                flops=flops, transcendentals=0, bytes_accessed=bytes_accessed),
        )

    args = (xr, xpr, xnr, w_x, w_prev, w_next, b_pack)
    try:
        out2d = jax.block_until_ready(build_call(True)(*args))
    except Exception:
        # Fallback if this JAX build rejects pipeline_mode=pl.Buffered(1).
        out2d = jax.block_until_ready(build_call(False)(*args))

    return out2d[:M, :H].reshape(B, L, H)


def phrase_cnn_ref(x, params):
    """Pure-JAX reference matching the PyTorch forward exactly (f32)."""
    w1, b1, w2, b2, w3, b3 = params
    B, L, H = x.shape
    zero = jnp.zeros((B, 1, H), x.dtype)
    xp = jnp.concatenate([zero, x[:, :-1]], axis=1)   # x[t-1]
    xn = jnp.concatenate([x[:, 1:], zero], axis=1)    # x[t+1]
    ein = lambda a, w: jnp.einsum('blh,oh->blo', a, w)
    uni = ein(x, w1[:, :, 0]) + b1
    big = ein(xp, w2[:, :, 0]) + ein(x, w2[:, :, 1]) + b2
    tri = ein(xp, w3[:, :, 0]) + ein(x, w3[:, :, 1]) + ein(xn, w3[:, :, 2]) + b3
    return jnp.maximum(jnp.maximum(uni, big), tri)


def init_params(key, hidden_size):
    """Deterministic synthetic Conv1d parameters (PyTorch layout: (out, in, k))."""
    H = hidden_size
    ks = jax.random.split(key, 6)
    scale = 0.1
    w1 = scale * jax.random.normal(ks[0], (H, H, 1), jnp.float32)
    b1 = scale * jax.random.normal(ks[1], (H,), jnp.float32)
    w2 = scale * jax.random.normal(ks[2], (H, H, 2), jnp.float32)
    b2 = scale * jax.random.normal(ks[3], (H,), jnp.float32)
    w3 = scale * jax.random.normal(ks[4], (H, H, 3), jnp.float32)
    b3 = scale * jax.random.normal(ks[5], (H,), jnp.float32)
    return (w1, b1, w2, b2, w3, b3)


if __name__ == "__main__":
    B, L, H = 2, 8, 32   # batch, seq_len, hidden_size
    key = jax.random.PRNGKey(0)
    k_x, k_p = jax.random.split(key)
    word_embeddings = jax.random.normal(k_x, (B, L, H), jnp.float32)
    params = init_params(k_p, H)

    ref = phrase_cnn_ref(word_embeddings, params)

    # f32 compute path
    out_f32 = phrase_cnn_pallas(word_embeddings, params)
    assert out_f32.shape == (B, L, H)
    assert jnp.allclose(out_f32, ref, atol=1e-2, rtol=1e-2), "f32 mismatch vs reference"

    # bf16-into-MXU path (recommended perf path) — looser tolerance vs f32 reference.
    out_bf16 = phrase_cnn_pallas(word_embeddings, params, compute_dtype=jnp.bfloat16)
    assert out_bf16.shape == (B, L, H)
    assert jnp.allclose(out_bf16, ref, atol=5e-2, rtol=5e-2), "bf16 mismatch vs reference"

    print("KERNEL_OK")
</pallas_src>

<mosaic_0001>
module attributes {stable_mosaic.version = 11 : i64} {
  func.func @phrase_cnn_kernel(%arg0: i32, %arg1: memref<16x128xf32, #tpu.memory_space<vmem>>, %arg2: memref<16x128xf32, #tpu.memory_space<vmem>>, %arg3: memref<16x128xf32, #tpu.memory_space<vmem>>, %arg4: memref<128x384xf32, #tpu.memory_space<vmem>>, %arg5: memref<128x256xf32, #tpu.memory_space<vmem>>, %arg6: memref<128x128xf32, #tpu.memory_space<vmem>>, %arg7: memref<1x384xf32, #tpu.memory_space<vmem>>, %arg8: memref<16x128xf32, #tpu.memory_space<vmem>>) attributes {dimension_semantics = [#tpu.dimension_semantics<parallel>], iteration_bounds = array<i64: 1>, scalar_prefetch = 0 : i64, scratch_operands = 0 : i64, tpu.core_type = #tpu.core_type<tc>, window_params = [{transform_indices = @transform_0, window_bounds = array<i64: 16, 128>}, {transform_indices = @transform_1, window_bounds = array<i64: 16, 128>}, {transform_indices = @transform_2, window_bounds = array<i64: 16, 128>}, {pipeline_mode = #tpu.pipeline_mode<synchronous>, transform_indices = @transform_3, window_bounds = array<i64: 128, 384>}, {pipeline_mode = #tpu.pipeline_mode<synchronous>, transform_indices = @transform_4, window_bounds = array<i64: 128, 256>}, {pipeline_mode = #tpu.pipeline_mode<synchronous>, transform_indices = @transform_5, window_bounds = array<i64: 128, 128>}, {pipeline_mode = #tpu.pipeline_mode<synchronous>, transform_indices = @transform_6, window_bounds = array<i64: 1, 384>}, {transform_indices = @transform_7, window_bounds = array<i64: 16, 128>}]} {
    %c0 = arith.constant 0 : index
    %c0_0 = arith.constant 0 : index
    %0 = vector.load %arg1[%c0, %c0_0] : memref<16x128xf32, #tpu.memory_space<vmem>>, vector<16x128xf32>
    %c0_1 = arith.constant 0 : index
    %c0_2 = arith.constant 0 : index
    %1 = vector.load %arg4[%c0_1, %c0_2] : memref<128x384xf32, #tpu.memory_space<vmem>>, vector<128x384xf32>
    %cst = arith.constant dense<0.000000e+00> : vector<16x384xf32>
    %2 = tpu.matmul %0, %1, %cst {dimension_numbers = #tpu.dot_dimension_numbers<[1], [0], [0], [1], [0, 0, 1, 1], [], []>} : vector<16x128xf32>, vector<128x384xf32>, vector<16x384xf32> -> vector<16x384xf32>
    %c0_3 = arith.constant 0 : index
    %c0_4 = arith.constant 0 : index
    %3 = vector.load %arg7[%c0_3, %c0_4] : memref<1x384xf32, #tpu.memory_space<vmem>>, vector<1x384xf32>
    %4 = vector.broadcast %3 : vector<1x384xf32> to vector<16x384xf32>
    %5 = arith.addf %2, %4 : vector<16x384xf32>
    %c0_5 = arith.constant 0 : index
    %c0_6 = arith.constant 0 : index
    %6 = vector.load %arg2[%c0_5, %c0_6] : memref<16x128xf32, #tpu.memory_space<vmem>>, vector<16x128xf32>
    %c0_7 = arith.constant 0 : index
    %c0_8 = arith.constant 0 : index
    %7 = vector.load %arg5[%c0_7, %c0_8] : memref<128x256xf32, #tpu.memory_space<vmem>>, vector<128x256xf32>
    %cst_9 = arith.constant dense<0.000000e+00> : vector<16x256xf32>
    %8 = tpu.matmul %6, %7, %cst_9 {dimension_numbers = #tpu.dot_dimension_numbers<[1], [0], [0], [1], [0, 0, 1, 1], [], []>} : vector<16x128xf32>, vector<128x256xf32>, vector<16x256xf32> -> vector<16x256xf32>
    %c0_10 = arith.constant 0 : index
    %c0_11 = arith.constant 0 : index
    %9 = vector.load %arg3[%c0_10, %c0_11] : memref<16x128xf32, #tpu.memory_space<vmem>>, vector<16x128xf32>
    %c0_12 = arith.constant 0 : index
    %c0_13 = arith.constant 0 : index
    %10 = vector.load %arg6[%c0_12, %c0_13] : memref<128x128xf32, #tpu.memory_space<vmem>>, vector<128x128xf32>
    %cst_14 = arith.constant dense<0.000000e+00> : vector<16x128xf32>
    %11 = tpu.matmul %9, %10, %cst_14 {dimension_numbers = #tpu.dot_dimension_numbers<[1], [0], [0], [1], [0, 0, 1, 1], [], []>} : vector<16x128xf32>, vector<128x128xf32>, vector<16x128xf32> -> vector<16x128xf32>
    %12 = vector.extract_strided_slice %5 {offsets = [0, 0], sizes = [16, 128], strides = [1, 1]} : vector<16x384xf32> to vector<16x128xf32>
    %13 = vector.extract_strided_slice %5 {offsets = [0, 128], sizes = [16, 128], strides = [1, 1]} : vector<16x384xf32> to vector<16x128xf32>
    %14 = vector.extract_strided_slice %8 {offsets = [0, 0], sizes = [16, 128], strides = [1, 1]} : vector<16x256xf32> to vector<16x128xf32>
    %15 = arith.addf %13, %14 : vector<16x128xf32>
    %16 = vector.extract_strided_slice %5 {offsets = [0, 256], sizes = [16, 128], strides = [1, 1]} : vector<16x384xf32> to vector<16x128xf32>
    %17 = vector.extract_strided_slice %8 {offsets = [0, 128], sizes = [16, 128], strides = [1, 1]} : vector<16x256xf32> to vector<16x128xf32>
    %18 = arith.addf %16, %17 : vector<16x128xf32>
    %19 = arith.addf %18, %11 : vector<16x128xf32>
    %20 = arith.maximumf %12, %15 : vector<16x128xf32>
    %21 = arith.maximumf %20, %19 : vector<16x128xf32>
    %c0_15 = arith.constant 0 : index
    %c0_16 = arith.constant 0 : index
    %22 = vector.load %arg8[%c0_15, %c0_16] : memref<16x128xf32, #tpu.memory_space<vmem>>, vector<16x128xf32>
    tpu.vector_store %arg8[%c0_15, %c0_16], %21 {strides = array<i32>} : memref<16x128xf32, #tpu.memory_space<vmem>>, vector<16x128xf32>,
    return
  }
  func.func @transform_0(%arg0: i32) -> (i32, i32) {
    %c0_i32 = arith.constant 0 : i32
    %c0_i32_0 = arith.constant 0 : i32
    return %arg0, %c0_i32 : i32, i32
  }
  func.func @transform_1(%arg0: i32) -> (i32, i32) {
    %c0_i32 = arith.constant 0 : i32
    %c0_i32_0 = arith.constant 0 : i32
    return %arg0, %c0_i32 : i32, i32
  }
  func.func @transform_2(%arg0: i32) -> (i32, i32) {
    %c0_i32 = arith.constant 0 : i32
    %c0_i32_0 = arith.constant 0 : i32
    return %arg0, %c0_i32 : i32, i32
  }
  func.func @transform_3(%arg0: i32) -> (i32, i32) {
    %c0_i32 = arith.constant 0 : i32
    %c0_i32_0 = arith.constant 0 : i32
    %c0_i32_1 = arith.constant 0 : i32
    return %c0_i32, %c0_i32_0 : i32, i32
  }
  func.func @transform_4(%arg0: i32) -> (i32, i32) {
    %c0_i32 = arith.constant 0 : i32
    %c0_i32_0 = arith.constant 0 : i32
    %c0_i32_1 = arith.constant 0 : i32
    return %c0_i32, %c0_i32_0 : i32, i32
  }
  func.func @transform_5(%arg0: i32) -> (i32, i32) {
    %c0_i32 = arith.constant 0 : i32
    %c0_i32_0 = arith.constant 0 : i32
    %c0_i32_1 = arith.constant 0 : i32
    return %c0_i32, %c0_i32_0 : i32, i32
  }
  func.func @transform_6(%arg0: i32) -> (i32, i32) {
    %c0_i32 = arith.constant 0 : i32
    %c0_i32_0 = arith.constant 0 : i32
    %c0_i32_1 = arith.constant 0 : i32
    return %c0_i32, %c0_i32_0 : i32, i32
  }
  func.func @transform_7(%arg0: i32) -> (i32, i32) {
    %c0_i32 = arith.constant 0 : i32
    %c0_i32_0 = arith.constant 0 : i32
    return %arg0, %c0_i32 : i32, i32
  }
}

module attributes {stable_mosaic.version = 11 : i64} {
  func.func @phrase_cnn_kernel(%arg0: i32, %arg1: memref<16x128xf32, #tpu.memory_space<vmem>>, %arg2: memref<16x128xf32, #tpu.memory_space<vmem>>, %arg3: memref<16x128xf32, #tpu.memory_space<vmem>>, %arg4: memref<128x384xf32, #tpu.memory_space<vmem>>, %arg5: memref<128x256xf32, #tpu.memory_space<vmem>>, %arg6: memref<128x128xf32, #tpu.memory_space<vmem>>, %arg7: memref<1x384xf32, #tpu.memory_space<vmem>>, %arg8: memref<16x128xf32, #tpu.memory_space<vmem>>) attributes {dimension_semantics = [#tpu.dimension_semantics<parallel>], iteration_bounds = array<i64: 1>, scalar_prefetch = 0 : i64, scratch_operands = 0 : i64, tpu.core_type = #tpu.core_type<tc>, window_params = [{transform_indices = @transform_0, window_bounds = array<i64: 16, 128>}, {transform_indices = @transform_1, window_bounds = array<i64: 16, 128>}, {transform_indices = @transform_2, window_bounds = array<i64: 16, 128>}, {pipeline_mode = #tpu.pipeline_mode<synchronous>, transform_indices = @transform_3, window_bounds = array<i64: 128, 384>}, {pipeline_mode = #tpu.pipeline_mode<synchronous>, transform_indices = @transform_4, window_bounds = array<i64: 128, 256>}, {pipeline_mode = #tpu.pipeline_mode<synchronous>, transform_indices = @transform_5, window_bounds = array<i64: 128, 128>}, {pipeline_mode = #tpu.pipeline_mode<synchronous>, transform_indices = @transform_6, window_bounds = array<i64: 1, 384>}, {transform_indices = @transform_7, window_bounds = array<i64: 16, 128>}]} {
    %c0 = arith.constant 0 : index
    %c0_0 = arith.constant 0 : index
    %0 = vector.load %arg1[%c0, %c0_0] : memref<16x128xf32, #tpu.memory_space<vmem>>, vector<16x128xf32>
    %c0_1 = arith.constant 0 : index
    %c0_2 = arith.constant 0 : index
    %1 = vector.load %arg4[%c0_1, %c0_2] : memref<128x384xf32, #tpu.memory_space<vmem>>, vector<128x384xf32>
    %cst = arith.constant dense<0.000000e+00> : vector<16x384xf32>
    %2 = tpu.matmul %0, %1, %cst {dimension_numbers = #tpu.dot_dimension_numbers<[1], [0], [0], [1], [0, 0, 1, 1], [], []>} : vector<16x128xf32>, vector<128x384xf32>, vector<16x384xf32> -> vector<16x384xf32>
    %c0_3 = arith.constant 0 : index
    %c0_4 = arith.constant 0 : index
    %3 = vector.load %arg7[%c0_3, %c0_4] : memref<1x384xf32, #tpu.memory_space<vmem>>, vector<1x384xf32>
    %4 = vector.broadcast %3 : vector<1x384xf32> to vector<16x384xf32>
    %5 = arith.addf %2, %4 : vector<16x384xf32>
    %c0_5 = arith.constant 0 : index
    %c0_6 = arith.constant 0 : index
    %6 = vector.load %arg2[%c0_5, %c0_6] : memref<16x128xf32, #tpu.memory_space<vmem>>, vector<16x128xf32>
    %c0_7 = arith.constant 0 : index
    %c0_8 = arith.constant 0 : index
    %7 = vector.load %arg5[%c0_7, %c0_8] : memref<128x256xf32, #tpu.memory_space<vmem>>, vector<128x256xf32>
    %cst_9 = arith.constant dense<0.000000e+00> : vector<16x256xf32>
    %8 = tpu.matmul %6, %7, %cst_9 {dimension_numbers = #tpu.dot_dimension_numbers<[1], [0], [0], [1], [0, 0, 1, 1], [], []>} : vector<16x128xf32>, vector<128x256xf32>, vector<16x256xf32> -> vector<16x256xf32>
    %c0_10 = arith.constant 0 : index
    %c0_11 = arith.constant 0 : index
    %9 = vector.load %arg3[%c0_10, %c0_11] : memref<16x128xf32, #tpu.memory_space<vmem>>, vector<16x128xf32>
    %c0_12 = arith.constant 0 : index
    %c0_13 = arith.constant 0 : index
    %10 = vector.load %arg6[%c0_12, %c0_13] : memref<128x128xf32, #tpu.memory_space<vmem>>, vector<128x128xf32>
    %cst_14 = arith.constant dense<0.000000e+00> : vector<16x128xf32>
    %11 = tpu.matmul %9, %10, %cst_14 {dimension_numbers = #tpu.dot_dimension_numbers<[1], [0], [0], [1], [0, 0, 1, 1], [], []>} : vector<16x128xf32>, vector<128x128xf32>, vector<16x128xf32> -> vector<16x128xf32>
    %12 = vector.extract_strided_slice %5 {offsets = [0, 0], sizes = [16, 128], strides = [1, 1]} : vector<16x384xf32> to vector<16x128xf32>
    %13 = vector.extract_strided_slice %5 {offsets = [0, 128], sizes = [16, 128], strides = [1, 1]} : vector<16x384xf32> to vector<16x128xf32>
    %14 = vector.extract_strided_slice %8 {offsets = [0, 0], sizes = [16, 128], strides = [1, 1]} : vector<16x256xf32> to vector<16x128xf32>
    %15 = arith.addf %13, %14 : vector<16x128xf32>
    %16 = vector.extract_strided_slice %5 {offsets = [0, 256], sizes = [16, 128], strides = [1, 1]} : vector<16x384xf32> to vector<16x128xf32>
    %17 = vector.extract_strided_slice %8 {offsets = [0, 128], sizes = [16, 128], strides = [1, 1]} : vector<16x256xf32> to vector<16x128xf32>
    %18 = arith.addf %16, %17 : vector<16x128xf32>
    %19 = arith.addf %18, %11 : vector<16x128xf32>
    %20 = arith.maximumf %12, %15 : vector<16x128xf32>
    %21 = arith.maximumf %20, %19 : vector<16x128xf32>
    %c0_15 = arith.constant 0 : index
    %c0_16 = arith.constant 0 : index
    %22 = vector.load %arg8[%c0_15, %c0_16] : memref<16x128xf32, #tpu.memory_space<vmem>>, vector<16x128xf32>
    tpu.vector_store %arg8[%c0_15, %c0_16], %21 {strides = array<i32>} : memref<16x128xf32, #tpu.memory_space<vmem>>, vector<16x128xf32>,
    return
  }
  func.func @transform_0(%arg0: i32) -> (i32, i32) {
    %c0_i32 = arith.constant 0 : i32
    %c0_i32_0 = arith.constant 0 : i32
    return %arg0, %c0_i32 : i32, i32
  }
  func.func @transform_1(%arg0: i32) -> (i32, i32) {
    %c0_i32 = arith.constant 0 : i32
    %c0_i32_0 = arith.constant 0 : i32
    return %arg0, %c0_i32 : i32, i32
  }
  func.func @transform_2(%arg0: i32) -> (i32, i32) {
    %c0_i32 = arith.constant 0 : i32
    %c0_i32_0 = arith.constant 0 : i32
    return %arg0, %c0_i32 : i32, i32
  }
  func.func @transform_3(%arg0: i32) -> (i32, i32) {
    %c0_i32 = arith.constant 0 : i32
    %c0_i32_0 = arith.constant 0 : i32
    %c0_i32_1 = arith.constant 0 : i32
    return %c0_i32, %c0_i32_0 : i32, i32
  }
  func.func @transform_4(%arg0: i32) -> (i32, i32) {
    %c0_i32 = arith.constant 0 : i32
    %c0_i32_0 = arith.constant 0 : i32
    %c0_i32_1 = arith.constant 0 : i32
    return %c0_i32, %c0_i32_0 : i32, i32
  }
  func.func @transform_5(%arg0: i32) -> (i32, i32) {
    %c0_i32 = arith.constant 0 : i32
    %c0_i32_0 = arith.constant 0 : i32
    %c0_i32_1 = arith.constant 0 : i32
    return %c0_i32, %c0_i32_0 : i32, i32
  }
  func.func @transform_6(%arg0: i32) -> (i32, i32) {
    %c0_i32 = arith.constant 0 : i32
    %c0_i32_0 = arith.constant 0 : i32
    %c0_i32_1 = arith.constant 0 : i32
    return %c0_i32, %c0_i32_0 : i32, i32
  }
  func.func @transform_7(%arg0: i32) -> (i32, i32) {
    %c0_i32 = arith.constant 0 : i32
    %c0_i32_0 = arith.constant 0 : i32
    return %arg0, %c0_i32 : i32, i32
  }
}

</mosaic_0001>

<bundles_post_ra>
// kernel: tpu_custom_call.1
= control target key start
LH: loop header
LB: loop body
LE: loop exit
PB: predicated region body
PF: predicated region fallthrough
CT: control target
= control target key end

     0   :  { %12 = vsyncpa [#allocation3], 0  ;;  %s935_s0 = inlined_call_operand.hbm [shape: f32[16,128], index: 0, kind: input, shape index: {}]   ;;  %s936_s1 = inlined_call_operand.hbm [shape: f32[16,128], index: 1, kind: input, shape index: {}]   ;;  %s937_s2 = inlined_call_operand.hbm [shape: f32[16,128], index: 2, kind: input, shape index: {}]   ;;  %s938_s3 = inlined_call_operand.hbm [shape: f32[128,384], index: 3, kind: input, shape index: {}]   ;;  %s939_s4 = inlined_call_operand.hbm [shape: f32[128,256], index: 4, kind: input, shape index: {}]   ;;  %s940_s5 = inlined_call_operand.hbm [shape: f32[128,128], index: 5, kind: input, shape index: {}]   ;;  %s941_s6 = inlined_call_operand.vmem [shape: f32[1,384], index: 6, kind: input, shape index: {}]   ;;  %s942_s7 = inlined_call_operand.hbm [shape: f32[16,128], index: 7, kind: output, shape index: {}]  }
   0x1   :  { %13 = vsyncpa [#allocation6], 0 }
   0x2   :  { %14 = vsyncpa [#allocation9], 0 }
   0x3   :  { %15 = vsyncpa [#allocation12], 0 }
   0x4   :  { %16 = vsyncpa [#allocation4], 0  ;;  %s834_s24 = smov [#allocation5]   ;;  %s835_s26 = smov [#allocation8]  }
   0x5   :  { %s34_s25 = sshll.u32 %s834_s24, 4  ;;  %s58_s27 = sshll.u32 %s835_s26, 4  ;;  %s35_s25 = int_to_ptr.vmem [resolvable:$true] %s34_s25  ;;  %s59_s27 = int_to_ptr.vmem [resolvable:$true] %s58_s27 }
   0x6   :  { %s692_s28 = scalar_lea.vmem %s35_s25, 256  ;;  %p697_p1 = scmp.lt.s32.totalorder %s35_s25, %s35_s25 }
   0x7   :  { %p693_p0 = scmp.ne.s32.totalorder %s35_s25, %s692_s28  ;;  %p698_p2 = scmp.lt.s32.totalorder %s692_s28, %s692_s28 }
   0x9   :  { %p699_p3 = por %p698_p2, %p697_p1 }
   0xb   :  { %p700_p4 = pnand %p699_p3, %p693_p0 }
   0xd   :  { %703 = shalt.err (!%p700_p4)
}
   0xe   :  { %s836_s29 = smov 128   ;;  %s837_s30 = smov 8  }
   0xf   :  { %40 = dma.hbm_to_vmem [thread:$0]  %s936_s1, 256, %s35_s25, [#allocation6], %s836_s29, %s836_s29, %s837_s30  }
  0x10   :  { %s712_s10 = scalar_lea.vmem %s59_s27, 6144  ;;  %p717_p6 = scmp.lt.s32.totalorder %s59_s27, %s59_s27 }
  0x11   :  { %p713_p5 = scmp.ne.s32.totalorder %s59_s27, %s712_s10  ;;  %p718_p7 = scmp.lt.s32.totalorder %s712_s10, %s712_s10 }
  0x13   :  { %p719_p8 = por %p718_p7, %p717_p6 }
  0x15   :  { %p720_p9 = pnand %p719_p8, %p713_p5 }
  0x17   :  { %723 = shalt.err (!%p720_p9)
}
  0x18   :  { %s838_s11 = smov 384   ;;  %s839_s12 = smov 24  }
  0x19   :  { %64 = dma.hbm_to_vmem [thread:$0]  %s938_s3, 6144, %s59_s27, [#allocation9], %s838_s11, %s838_s11, %s839_s12  }
  0x1a   :  { %s840_s15 = smov [#allocation2]   ;;  %s841_s17 = smov [#allocation7]  }
  0x1b   :  { %s22_s16 = sshll.u32 %s840_s15, 4  ;;  %s46_s18 = sshll.u32 %s841_s17, 4  ;;  %s23_s16 = int_to_ptr.vmem [resolvable:$true] %s22_s16  ;;  %s47_s18 = int_to_ptr.vmem [resolvable:$true] %s46_s18 }
  0x1c   :  { %s732_s1 = scalar_lea.vmem %s23_s16, 256  ;;  %p737_p11 = scmp.lt.s32.totalorder %s23_s16, %s23_s16 }
  0x1d   :  { %p733_p10 = scmp.ne.s32.totalorder %s23_s16, %s732_s1  ;;  %p738_p12 = scmp.lt.s32.totalorder %s732_s1, %s732_s1 }
  0x1f   :  { %p739_p13 = por %p738_p12, %p737_p11 }
  0x21   :  { %p740_p0 = pnand %p739_p13, %p733_p10 }
  0x23   :  { %743 = shalt.err (!%p740_p0)
}
  0x24   :  { %28 = dma.hbm_to_vmem [thread:$0]  %s935_s0, 256, %s23_s16, [#allocation3], %s836_s29, %s836_s29, %s837_s30  }
  0x25   :  { %s752_s3 = scalar_lea.vmem %s47_s18, 256  ;;  %p757_p2 = scmp.lt.s32.totalorder %s47_s18, %s47_s18 }
  0x26   :  { %p753_p1 = scmp.ne.s32.totalorder %s47_s18, %s752_s3  ;;  %p758_p3 = scmp.lt.s32.totalorder %s752_s3, %s752_s3 }
  0x28   :  { %p759_p4 = por %p758_p3, %p757_p2 }
  0x2a   :  { %p760_p5 = pnand %p759_p4, %p753_p1 }
  0x2c   :  { %763 = shalt.err (!%p760_p5)
}
  0x2d   :  { %52 = dma.hbm_to_vmem [thread:$0]  %s937_s2, 256, %s47_s18, [#allocation6], %s836_s29, %s836_s29, %s837_s30  }
  0x2e   :  { %s842_s23 = smov [#allocation10]  }
  0x2f   :  { %s70_s24 = sshll.u32 %s842_s23, 4  ;;  %s71_s24 = int_to_ptr.vmem [resolvable:$true] %s70_s24 }
  0x30   :  { %s772_s25 = scalar_lea.vmem %s71_s24, 4096  ;;  %p777_p7 = scmp.lt.s32.totalorder %s71_s24, %s71_s24 }
  0x31   :  { %p773_p6 = scmp.ne.s32.totalorder %s71_s24, %s772_s25  ;;  %p778_p8 = scmp.lt.s32.totalorder %s772_s25, %s772_s25 }
  0x33   :  { %p779_p9 = por %p778_p8, %p777_p7 }
  0x35   :  { %p780_p10 = pnand %p779_p9, %p773_p6 }
  0x37   :  { %783 = shalt.err (!%p780_p10)
}
  0x38   :  { %s843_s0 = smov 256   ;;  %s844_s26 = smov 16  }
  0x39   :  { %76 = dma.hbm_to_vmem [thread:$0]  %s939_s4, 4096, %s71_s24, [#allocation9], %s843_s0, %s843_s0, %s844_s26  }
  0x3a   :  { %s845_s8 = smov [#allocation11]  }
  0x3b   :  { %s82_s9 = sshll.u32 %s845_s8, 4  ;;  %s83_s9 = int_to_ptr.vmem [resolvable:$true] %s82_s9 }
  0x3c   :  { %s792_s2 = scalar_lea.vmem %s83_s9, 2048  ;;  %p797_p12 = scmp.lt.s32.totalorder %s83_s9, %s83_s9 }
  0x3d   :  { %p793_p11 = scmp.ne.s32.totalorder %s83_s9, %s792_s2  ;;  %p798_p13 = scmp.lt.s32.totalorder %s792_s2, %s792_s2 }
  0x3f   :  { %p799_p0 = por %p798_p13, %p797_p12 }
  0x41   :  { %p800_p1 = pnand %p799_p0, %p793_p11 }
  0x43   :  { %803 = shalt.err (!%p800_p1)
}
  0x44   :  { %88 = dma.hbm_to_vmem [thread:$0]  %s940_s5, 2048, %s83_s9, [#allocation12], %s836_s29, %s836_s29, %s837_s30  }
  0x45   :  { %824 = dma.done.wait [#allocation3], 256  }
  0x46   :  { %825 = vsyncadd [#allocation3], 4294967040 }
  0x47   :  { %826 = dma.done.wait [#allocation6], 512  }
  0x48   :  { %827 = vsyncadd [#allocation6], 4294966784 }
  0x49   :  { %828 = dma.done.wait [#allocation9], 10240  }
  0x4a   :  { %829 = vsyncadd [#allocation9], 4294957056 }
  0x4b   :  { %830 = dma.done.wait [#allocation12], 2048  }
  0x4c   :  { %831 = vsyncadd [#allocation12], 4294965248  ;;  %v846_v0 = vmov 0.0   ;;  %v157_v1 = vld [vmem:[#allocation8 + $0x170] sm:$0xff]  ;;  %v156_v2 = vld [vmem:[#allocation8 + $0x168] sm:$0xff] }
  0x4d   :  { %240 = vmatprep.mubr.f32.mxu0 %v846_v0  ;;  %v154_v3 = vld [vmem:[#allocation8 + $0x158] sm:$0xff]  ;;  %176 = vmatprep.subr.mxu0 %v157_v1  ;;  %v153_v5 = vld [vmem:[#allocation8 + $0x150] sm:$0xff]  ;;  %v151_v6 = vld [vmem:[#allocation8 + $0x140] sm:$0xff] }
  0x4e   :  { %v158_v4 = vld [vmem:[#allocation8 + $0x178] sm:$0xff]  ;;  %177 = vmatpush1.msra.mxu0 %v156_v2  ;;  %v155_v7 = vld [vmem:[#allocation8 + $0x160] sm:$0xff]  ;;  %v152_v9 = vld [vmem:[#allocation8 + $0x148] sm:$0xff] }
  0x4f   :  { %600 = vmatprep.subr.mxu1 %v158_v4  ;;  %178 = vmatprep.subr.mxu0 %v154_v3  ;;  %v150_v8 = vld [vmem:[#allocation8 + $0x138] sm:$0xff]  ;;  %v148_v10 = vld [vmem:[#allocation8 + $0x128] sm:$0xff]  ;;  %v147_v11 = vld [vmem:[#allocation8 + $0x120] sm:$0xff] }
  0x50   :  { %601 = vmatpush3.msra.mxu1 %v158_v4  ;;  %179 = vmatpush1.msra.mxu0 %v153_v5  ;;  %v149_v12 = vld [vmem:[#allocation8 + $0x130] sm:$0xff]  ;;  %v144_v14 = vld [vmem:[#allocation8 + $0x108] sm:$0xff]  ;;  %v146_v15 = vld [vmem:[#allocation8 + $0x118] sm:$0xff] }
  0x51   :  { %602 = vmatprep.subr.mxu1 %v155_v7  ;;  %180 = vmatprep.subr.mxu0 %v151_v6  ;;  %v145_v13 = vld [vmem:[#allocation8 + $0x110] sm:$0xff]  ;;  %v142_v16 = vld [vmem:[#allocation8 + $0xf8] sm:$0xff]  ;;  %v143_v18 = vld [vmem:[#allocation8 + $0x100] sm:$0xff] }
  0x52   :  { %603 = vmatpush3.msra.mxu1 %v155_v7  ;;  %181 = vmatpush1.msra.mxu0 %v150_v8  ;;  %v141_v17 = vld [vmem:[#allocation8 + $0xf0] sm:$0xff]  ;;  %v139_v19 = vld [vmem:[#allocation8 + $0xe0] sm:$0xff]  ;;  %v138_v20 = vld [vmem:[#allocation8 + $0xd8] sm:$0xff] }
  0x53   :  { %604 = vmatprep.subr.mxu1 %v152_v9  ;;  %182 = vmatprep.subr.mxu0 %v148_v10  ;;  %v140_v21 = vld [vmem:[#allocation8 + $0xe8] sm:$0xff]  ;;  %v135_v23 = vld [vmem:[#allocation8 + $0xc0] sm:$0xff]  ;;  %v137_v24 = vld [vmem:[#allocation8 + $0xd0] sm:$0xff] }
  0x54   :  { %605 = vmatpush3.msra.mxu1 %v152_v9  ;;  %183 = vmatpush1.msra.mxu0 %v147_v11  ;;  %v136_v22 = vld [vmem:[#allocation8 + $0xc8] sm:$0xff]  ;;  %v133_v25 = vld [vmem:[#allocation8 + $0xb0] sm:$0xff]  ;;  %v134_v27 = vld [vmem:[#allocation8 + $0xb8] sm:$0xff] }
  0x55   :  { %606 = vmatprep.subr.mxu1 %v149_v12  ;;  %184 = vmatprep.subr.mxu0 %v145_v13  ;;  %v132_v26 = vld [vmem:[#allocation8 + $0xa8] sm:$0xff]  ;;  %v130_v28 = vld [vmem:[#allocation8 + $0x98] sm:$0xff]  ;;  %v129_v29 = vld [vmem:[#allocation8 + $0x90] sm:$0xff] }
  0x56   :  { %607 = vmatpush3.msra.mxu1 %v149_v12  ;;  %185 = vmatpush1.msra.mxu0 %v144_v14  ;;  %v131_v30 = vld [vmem:[#allocation8 + $0xa0] sm:$0xff]  ;;  %v126_v32 = vld [vmem:[#allocation8 + $0x78] sm:$0xff]  ;;  %v128_v33 = vld [vmem:[#allocation8 + $0x88] sm:$0xff] }
  0x57   :  { %608 = vmatprep.subr.mxu1 %v146_v15  ;;  %186 = vmatprep.subr.mxu0 %v142_v16  ;;  %v127_v31 = vld [vmem:[#allocation8 + $0x80] sm:$0xff]  ;;  %v124_v34 = vld [vmem:[#allocation8 + $0x68] sm:$0xff]  ;;  %v125_v36 = vld [vmem:[#allocation8 + $0x70] sm:$0xff] }
  0x58   :  { %609 = vmatpush3.msra.mxu1 %v146_v15  ;;  %187 = vmatpush1.msra.mxu0 %v141_v17  ;;  %v123_v35 = vld [vmem:[#allocation8 + $0x60] sm:$0xff]  ;;  %v121_v37 = vld [vmem:[#allocation8 + $0x50] sm:$0xff]  ;;  %v120_v38 = vld [vmem:[#allocation8 + $0x48] sm:$0xff] }
  0x59   :  { %610 = vmatprep.subr.mxu1 %v143_v18  ;;  %188 = vmatprep.subr.mxu0 %v139_v19  ;;  %v122_v39 = vld [vmem:[#allocation8 + $0x58] sm:$0xff]  ;;  %v117_v41 = vld [vmem:[#allocation8 + $0x30] sm:$0xff]  ;;  %v119_v42 = vld [vmem:[#allocation8 + $0x40] sm:$0xff] }
  0x5a   :  { %611 = vmatpush3.msra.mxu1 %v143_v18  ;;  %189 = vmatpush1.msra.mxu0 %v138_v20  ;;  %v118_v40 = vld [vmem:[#allocation8 + $0x38] sm:$0xff]  ;;  %v115_v43 = vld [vmem:[#allocation8 + $0x20] sm:$0xff]  ;;  %v116_v45 = vld [vmem:[#allocation8 + $0x28] sm:$0xff] }
  0x5b   :  { %612 = vmatprep.subr.mxu1 %v140_v21  ;;  %190 = vmatprep.subr.mxu0 %v136_v22  ;;  %v114_v44 = vld [vmem:[#allocation8 + $0x18] sm:$0xff]  ;;  %v112_v46 = vld [vmem:[#allocation8 + $0x8] sm:$0xff]  ;;  %v111_v47 = vld [vmem:[#allocation8] sm:$0xff] }
  0x5c   :  { %613 = vmatpush3.msra.mxu1 %v140_v21  ;;  %191 = vmatpush1.msra.mxu0 %v135_v23  ;;  %v113_v48 = vld [vmem:[#allocation8 + $0x10] sm:$0xff]  ;;  %v361_v50 = vld [vmem:[#allocation10 + $0xf8] sm:$0xff]  ;;  %v359_v52 = vld [vmem:[#allocation10 + $0xe8] sm:$0xff] }
  0x5d   :  { %614 = vmatprep.subr.mxu1 %v137_v24  ;;  %192 = vmatprep.subr.mxu0 %v133_v25  ;;  %v109_v49 = vld [vmem:[#allocation2] sm:$0xff]  ;;  %v456_v53 = vld [vmem:[#allocation11 + $0x78] sm:$0xff]  ;;  %v358_v55 = vld [vmem:[#allocation10 + $0xe0] sm:$0xff] }
  0x5e   :  { %615 = vmatpush3.msra.mxu1 %v137_v24  ;;  %193 = vmatpush1.msra.mxu0 %v132_v26  ;;  %v360_v51 = vld [vmem:[#allocation10 + $0xf0] sm:$0xff]  ;;  %v919_v54 = vld [vmem:[#allocation2 + $0x8] sm:$0xff]  ;;  %v355_v59 = vld [vmem:[#allocation10 + $0xc8] sm:$0xff] }
  0x5f   :  { %616 = vmatprep.subr.mxu1 %v134_v27  ;;  %194 = vmatprep.subr.mxu0 %v130_v28  ;;  %v357_v56 = vld [vmem:[#allocation10 + $0xd8] sm:$0xff]  ;;  %v455_v57 = vld [vmem:[#allocation11 + $0x70] sm:$0xff]  ;;  %v454_v60 = vld [vmem:[#allocation11 + $0x68] sm:$0xff] }
  0x60   :  { %617 = vmatpush3.msra.mxu1 %v134_v27  ;;  %195 = vmatpush1.msra.mxu0 %v129_v29  ;;  %v356_v58 = vld [vmem:[#allocation10 + $0xd0] sm:$0xff]  ;;  %v354_v61 = vld [vmem:[#allocation10 + $0xc0] sm:$0xff]  ;;  %v353_v62 = vld [vmem:[#allocation10 + $0xb8] sm:$0xff] }
  0x61   :  { %618 = vmatprep.subr.mxu1 %v131_v30  ;;  %196 = vmatprep.subr.mxu0 %v127_v31  ;;  %v453_v63 = vld [vmem:[#allocation11 + $0x60] sm:$0xff]  ;;  %v352_v1 = vld [vmem:[#allocation10 + $0xb0] sm:$0xff]  ;;  %v351_v2 = vld [vmem:[#allocation10 + $0xa8] sm:$0xff] }
  0x62   :  { %619 = vmatpush3.msra.mxu1 %v131_v30  ;;  %197 = vmatpush1.msra.mxu0 %v126_v32  ;;  %v452_v3 = vld [vmem:[#allocation11 + $0x58] sm:$0xff]  ;;  %v350_v4 = vld [vmem:[#allocation10 + $0xa0] sm:$0xff]  ;;  %v451_v6 = vld [vmem:[#allocation11 + $0x50] sm:$0xff] }
  0x63   :  { %620 = vmatprep.subr.mxu1 %v128_v33  ;;  %198 = vmatprep.subr.mxu0 %v124_v34  ;;  %v349_v5 = vld [vmem:[#allocation10 + $0x98] sm:$0xff]  ;;  %v348_v7 = vld [vmem:[#allocation10 + $0x90] sm:$0xff]  ;;  %v347_v8 = vld [vmem:[#allocation10 + $0x88] sm:$0xff] }
  0x64   :  { %621 = vmatpush3.msra.mxu1 %v128_v33  ;;  %199 = vmatpush1.msra.mxu0 %v123_v35  ;;  %v450_v9 = vld [vmem:[#allocation11 + $0x48] sm:$0xff]  ;;  %v346_v10 = vld [vmem:[#allocation10 + $0x80] sm:$0xff]  ;;  %v345_v11 = vld [vmem:[#allocation10 + $0x78] sm:$0xff] }
  0x65   :  { %622 = vmatprep.subr.mxu1 %v125_v36  ;;  %200 = vmatprep.subr.mxu0 %v121_v37  ;;  %v449_v12 = vld [vmem:[#allocation11 + $0x40] sm:$0xff]  ;;  %v344_v13 = vld [vmem:[#allocation10 + $0x70] sm:$0xff]  ;;  %v343_v14 = vld [vmem:[#allocation10 + $0x68] sm:$0xff] }
  0x66   :  { %623 = vmatpush3.msra.mxu1 %v125_v36  ;;  %201 = vmatpush1.msra.mxu0 %v120_v38  ;;  %v448_v15 = vld [vmem:[#allocation11 + $0x38] sm:$0xff]  ;;  %v342_v16 = vld [vmem:[#allocation10 + $0x60] sm:$0xff]  ;;  %v447_v18 = vld [vmem:[#allocation11 + $0x30] sm:$0xff] }
  0x67   :  { %624 = vmatprep.subr.mxu1 %v122_v39  ;;  %202 = vmatprep.subr.mxu0 %v118_v40  ;;  %v341_v17 = vld [vmem:[#allocation10 + $0x58] sm:$0xff]  ;;  %v340_v19 = vld [vmem:[#allocation10 + $0x50] sm:$0xff]  ;;  %v339_v20 = vld [vmem:[#allocation10 + $0x48] sm:$0xff]  ;;  %v161_v40 = vlaneseq }
  0x68   :  { %625 = vmatpush3.msra.mxu1 %v122_v39  ;;  %203 = vmatpush1.msra.mxu0 %v117_v41  ;;  %v446_v21 = vld [vmem:[#allocation11 + $0x28] sm:$0xff]  ;;  %v338_v22 = vld [vmem:[#allocation10 + $0x40] sm:$0xff]  ;;  %v337_v23 = vld [vmem:[#allocation10 + $0x38] sm:$0xff] }
  0x69   :  { %626 = vmatprep.subr.mxu1 %v119_v42  ;;  %204 = vmatprep.subr.mxu0 %v115_v43  ;;  %v445_v24 = vld [vmem:[#allocation11 + $0x20] sm:$0xff]  ;;  %v336_v25 = vld [vmem:[#allocation10 + $0x30] sm:$0xff]  ;;  %v335_v26 = vld [vmem:[#allocation10 + $0x28] sm:$0xff]  ;;  %v162_v41 = vshrl.u32 %v161_v40, 7 }
  0x6a   :  { %627 = vmatpush3.msra.mxu1 %v119_v42  ;;  %205 = vmatpush1.msra.mxu0 %v114_v44  ;;  %v444_v27 = vld [vmem:[#allocation11 + $0x18] sm:$0xff]  ;;  %v334_v28 = vld [vmem:[#allocation10 + $0x20] sm:$0xff]  ;;  %v443_v30 = vld [vmem:[#allocation11 + $0x10] sm:$0xff] }
  0x6b   :  { %628 = vmatprep.subr.mxu1 %v116_v45  ;;  %206 = vmatprep.subr.mxu0 %v112_v46  ;;  %v333_v29 = vld [vmem:[#allocation10 + $0x18] sm:$0xff]  ;;  %v332_v31 = vld [vmem:[#allocation10 + $0x10] sm:$0xff]  ;;  %v331_v32 = vld [vmem:[#allocation10 + $0x8] sm:$0xff]  ;;  %v167_v43 = vsub.s32 1, %v162_v41  ;;  %v171_v46 = vsub.s32 2, %v162_v41 }
  0x6c   :  { %629 = vmatpush3.msra.mxu1 %v116_v45  ;;  %207 = vmatpush1.msra.mxu0 %v111_v47  ;;  %v442_v33 = vld [vmem:[#allocation11 + $0x8] sm:$0xff]  ;;  %v330_v34 = vld [vmem:[#allocation10] sm:$0xff]  ;;  %v439_v37 = vld [vmem:[#allocation7] sm:$0xff] }
  0x6d   :  { %630 = vmatprep.subr.mxu1 %v113_v48  ;;  %241 = vmatmul.mubr.f32.vlgmr.msra.gmra.mxu0 %v109_v49  ;;  %v328_v35 = vld [vmem:[#allocation5] sm:$0xff]  ;;  %v440_v38 = vld [vmem:[#allocation7 + $0x8] sm:$0xff]  ;;  %v329_v39 = vld [vmem:[#allocation5 + $0x8] sm:$0xff] }
  0x6e   :  { %362 = vmatprep.subr.mxu0 %v361_v50  ;;  %631 = vmatpush3.msra.mxu1 %v113_v48  ;;  %v441_v36 = vld [vmem:[#allocation11] sm:$0xff]  ;;  %v159_v45 = vld [vmem:[%s941_s6] sm:$0x7]  ;;  %s847_s6 = smov [#allocation13]  }
  0x6f   :  { %363 = vmatpush1.msra.mxu0 %v360_v51  ;;  %632 = vmatprep.mubr.f32.mxu1 %v109_v49  ;;  %v163_v49 = vsub.s32 0, %v162_v41  ;;  %v168_v50 = vrot.slane %v159_v45, %v167_v43  ;;  %v172_v51 = vrot.slane %v159_v45, %v171_v46  ;;  %s549_s12 = sshll.u32 %s847_s6, 4  ;;  %s550_s12 = int_to_ptr.vmem [resolvable:$true] %s549_s12 }
  0x70   :  { %364 = vmatprep.subr.mxu0 %v359_v52  ;;  %635 = vmatprep.subr.mxu1 %v456_v53  ;;  %s804_s13 = scalar_lea.vmem %s550_s12, 256  ;;  %p809_p3 = scmp.lt.s32.totalorder %s550_s12, %s550_s12 }
  0x71   :  { %633 = vmatmul.mubr.f32.vlgmr.msra.gmra.mxu1 %v919_v54  ;;  %365 = vmatpush1.msra.mxu0 %v358_v55  ;;  %p805_p2 = scmp.ne.s32.totalorder %s550_s12, %s804_s13  ;;  %p810_p4 = scmp.lt.s32.totalorder %s804_s13, %s804_s13 }
  0x72   :  { %636 = vmatpush3.msra.mxu1 %v456_v53  ;;  %366 = vmatprep.subr.mxu0 %v357_v56 }
  0x73   :  { %637 = vmatprep.subr.mxu1 %v455_v57  ;;  %367 = vmatpush1.msra.mxu0 %v356_v58  ;;  %p811_p5 = por %p810_p4, %p809_p3 }
  0x74   :  { %638 = vmatpush3.msra.mxu1 %v455_v57  ;;  %368 = vmatprep.subr.mxu0 %v355_v59 }
  0x75   :  { %639 = vmatprep.subr.mxu1 %v454_v60  ;;  %369 = vmatpush1.msra.mxu0 %v354_v61  ;;  %p812_p6 = pnand %p811_p5, %p805_p2 }
  0x76   :  { %640 = vmatpush3.msra.mxu1 %v454_v60  ;;  %370 = vmatprep.subr.mxu0 %v353_v62 }
  0x77   :  { %641 = vmatprep.subr.mxu1 %v453_v63  ;;  %371 = vmatpush1.msra.mxu0 %v352_v1 }
  0x78   :  { %642 = vmatpush3.msra.mxu1 %v453_v63  ;;  %372 = vmatprep.subr.mxu0 %v351_v2 }
  0x79   :  { %643 = vmatprep.subr.mxu1 %v452_v3  ;;  %373 = vmatpush1.msra.mxu0 %v350_v4 }
  0x7a   :  { %644 = vmatpush3.msra.mxu1 %v452_v3  ;;  %374 = vmatprep.subr.mxu0 %v349_v5 }
  0x7b   :  { %645 = vmatprep.subr.mxu1 %v451_v6  ;;  %375 = vmatpush1.msra.mxu0 %v348_v7 }
  0x7c   :  { %646 = vmatpush3.msra.mxu1 %v451_v6  ;;  %376 = vmatprep.subr.mxu0 %v347_v8 }
  0x7d   :  { %647 = vmatprep.subr.mxu1 %v450_v9  ;;  %377 = vmatpush1.msra.mxu0 %v346_v10 }
  0x7e   :  { %648 = vmatpush3.msra.mxu1 %v450_v9  ;;  %378 = vmatprep.subr.mxu0 %v345_v11 }
  0x7f   :  { %649 = vmatprep.subr.mxu1 %v449_v12  ;;  %379 = vmatpush1.msra.mxu0 %v344_v13 }
  0x80   :  { %650 = vmatpush3.msra.mxu1 %v449_v12  ;;  %380 = vmatprep.subr.mxu0 %v343_v14 }
  0x81   :  { %651 = vmatprep.subr.mxu1 %v448_v15  ;;  %381 = vmatpush1.msra.mxu0 %v342_v16 }
  0x82   :  { %652 = vmatpush3.msra.mxu1 %v448_v15  ;;  %382 = vmatprep.subr.mxu0 %v341_v17 }
  0x83   :  { %653 = vmatprep.subr.mxu1 %v447_v18  ;;  %383 = vmatpush1.msra.mxu0 %v340_v19 }
  0x84   :  { %654 = vmatpush3.msra.mxu1 %v447_v18  ;;  %384 = vmatprep.subr.mxu0 %v339_v20 }
  0x85   :  { %655 = vmatprep.subr.mxu1 %v446_v21  ;;  %385 = vmatpush1.msra.mxu0 %v338_v22 }
  0x86   :  { %656 = vmatpush3.msra.mxu1 %v446_v21  ;;  %386 = vmatprep.subr.mxu0 %v337_v23 }
  0x87   :  { %657 = vmatprep.subr.mxu1 %v445_v24  ;;  %246 = vmatprep.mubr.f32.mxu0 %v846_v0 }
  0x88   :  { %387 = vmatpush1.msra.mxu0 %v336_v25  ;;  %658 = vmatpush3.msra.mxu1 %v445_v24 }
  0x89   :  { %247 = vmatmul.mubr.f32.gmra.mxu0 %v919_v54  ;;  %388 = vmatprep.subr.mxu0 %v335_v26 }
  0x8a   :  { %659 = vmatprep.subr.mxu1 %v444_v27  ;;  %389 = vmatpush1.msra.mxu0 %v334_v28 }
  0x8b   :  { %660 = vmatpush3.msra.mxu1 %v444_v27  ;;  %390 = vmatprep.subr.mxu0 %v333_v29 }
  0x8c   :  { %661 = vmatprep.subr.mxu1 %v443_v30  ;;  %391 = vmatpush1.msra.mxu0 %v332_v31 }
  0x8d   :  { %662 = vmatpush3.msra.mxu1 %v443_v30  ;;  %392 = vmatprep.subr.mxu0 %v331_v32 }
  0x8e   :  { %663 = vmatprep.subr.mxu1 %v442_v33  ;;  %393 = vmatpush1.msra.mxu0 %v330_v34 }
  0x8f   :  { %426 = vmatprep.mubr.f32.mxu0 %v846_v0  ;;  %664 = vmatpush3.msra.mxu1 %v442_v33 }
  0x90   :  { %427 = vmatmul.mubr.f32.vlgmr.msra.gmra.mxu0 %v328_v35  ;;  %665 = vmatprep.subr.mxu1 %v441_v36 }
  0x91   :  { %667 = vmatprep.mubr.f32.mxu1 %v439_v37  ;;  %666 = vmatpush3.msra.mxu1 %v441_v36 }
  0x92   :  { %432 = vmatprep.mubr.f32.mxu0 %v846_v0  ;;  %668 = vmatmul.mubr.f32.vlgmr.msra.gmra.mxu1 %v440_v38  ;;  %v164_v0 = vrot.slane %v159_v45, %v163_v49 }
  0x94   :  { %433 = vmatmul.mubr.f32.gmra.mxu0 %v329_v39 }
 0x12d   :  { %v242_v42 = vpop.f32.mrf.mxu0 }
 0x12e   :  { %v243_v62 = vadd.f32 %v242_v42, %v164_v0 }
 0x12f   :  { %v244_v44 = vpop.f32.mrf.mxu0 }
 0x130   :  { %v245_v54 = vadd.f32 %v244_v44, %v168_v50 }
 0x131   :  { %v634_v47 = vpop.f32.mrf.mxu1 }
 0x132   :  { %v325_v1 = vadd.f32 %v634_v47, %v172_v51 }
 0x133   :  { %v319_v52 = vpop.f32.mrf.mxu1 }
 0x134   :  { %v320_v56 = vadd.f32 %v319_v52, %v172_v51 }
 0x149   :  { %v248_v48 = vpop.f32.mrf.mxu0 }
 0x14a   :  { %v249_v7 = vadd.f32 %v248_v48, %v164_v0 }
 0x14b   :  { %v250_v53 = vpop.f32.mrf.mxu0 }
 0x14c   :  { %v251_v59 = vadd.f32 %v250_v53, %v168_v50 }
 0x150   :  { %v428_v55 = vpop.f32.mrf.mxu0 }
 0x151   :  { %v532_v57 = vadd.f32 %v428_v55, %v245_v54 }
 0x152   :  { %v430_v58 = vpop.f32.mrf.mxu0  ;;  %v669_v61 = vpop.f32.mrf.mxu1 }
 0x153   :  { %v534_v60 = vadd.f32 %v430_v58, %v320_v56  ;;  %v538_v4 = vmax.f32 %v243_v62, %v532_v57 }
 0x154   :  { %v434_v63 = vpop.f32.mrf.mxu0  ;;  %v523_v3 = vpop.f32.mrf.mxu1 }
 0x155   :  { %v533_v2 = vadd.f32 %v434_v63, %v251_v59  ;;  %v536_v5 = vadd.f32 %v534_v60, %v523_v3 }
 0x156   :  { %v436_v6 = vpop.f32.mrf.mxu0 }
 0x157   :  { %v535_v8 = vadd.f32 %v436_v6, %v325_v1  ;;  %v540_v9 = vmax.f32 %v538_v4, %v536_v5  ;;  %v539_v10 = vmax.f32 %v249_v7, %v533_v2 }
 0x159   :  { %v537_v11 = vadd.f32 %v669_v61, %v535_v8  ;;  %542 = vst [vmem:[#allocation13] sm:$0xff] %v540_v9 }
 0x15b   :  { %v541_v12 = vmax.f32 %v539_v10, %v537_v11 }
 0x15d   :  { %543 = vst [vmem:[#allocation13 + $0x8] sm:$0xff] %v541_v12 }
 0x15e   :  { %815 = shalt.err (!%p812_p6)
}
 0x15f   :  { %555 = dma.vmem_to_hbm [thread:$0]  %s550_s12, 256, %s942_s7, [#allocation4], %s836_s29, %s836_s29, %s837_s30  }
 0x160   :  { %832 = dma.done.wait [#allocation4], 256  }
 0x161   :  { %833 = vsyncadd [#allocation4], 4294967040 }
 0x162   :  { %559 = vsyncpa [#allocation3], 1 }
 0x163   :  { %560 = vsyncpa [#allocation6], 1 }
 0x164   :  { %561 = vsyncpa [#allocation9], 1 }
 0x165   :  { %562 = vsyncpa [#allocation12], 1 }
 0x166   :  { %563 = vsyncpa [#allocation4], 1 }

// kernel: tpu_custom_call.1
= control target key start
LH: loop header
LB: loop body
LE: loop exit
PB: predicated region body
PF: predicated region fallthrough
CT: control target
= control target key end

     0   :  { %12 = vsyncpa [#allocation3], 0  ;;  %s935_s0 = inlined_call_operand.hbm [shape: f32[16,128], index: 0, kind: input, shape index: {}]   ;;  %s936_s1 = inlined_call_operand.hbm [shape: f32[16,128], index: 1, kind: input, shape index: {}]   ;;  %s937_s2 = inlined_call_operand.hbm [shape: f32[16,128], index: 2, kind: input, shape index: {}]   ;;  %s938_s3 = inlined_call_operand.hbm [shape: f32[128,384], index: 3, kind: input, shape index: {}]   ;;  %s939_s4 = inlined_call_operand.hbm [shape: f32[128,256], index: 4, kind: input, shape index: {}]   ;;  %s940_s5 = inlined_call_operand.hbm [shape: f32[128,128], index: 5, kind: input, shape index: {}]   ;;  %s941_s6 = inlined_call_operand.vmem [shape: f32[1,384], index: 6, kind: input, shape index: {}]   ;;  %s942_s7 = inlined_call_operand.hbm [shape: f32[16,128], index: 7, kind: output, shape index: {}]  }
   0x1   :  { %13 = vsyncpa [#allocation6], 0 }
   0x2   :  { %14 = vsyncpa [#allocation9], 0 }
   0x3   :  { %15 = vsyncpa [#allocation12], 0 }
   0x4   :  { %16 = vsyncpa [#allocation4], 0  ;;  %s834_s24 = smov [#allocation5]   ;;  %s835_s26 = smov [#allocation8]  }
   0x5   :  { %s34_s25 = sshll.u32 %s834_s24, 4  ;;  %s58_s27 = sshll.u32 %s835_s26, 4  ;;  %s35_s25 = int_to_ptr.vmem [resolvable:$true] %s34_s25  ;;  %s59_s27 = int_to_ptr.vmem [resolvable:$true] %s58_s27 }
   0x6   :  { %s692_s28 = scalar_lea.vmem %s35_s25, 256  ;;  %p697_p1 = scmp.lt.s32.totalorder %s35_s25, %s35_s25 }
   0x7   :  { %p693_p0 = scmp.ne.s32.totalorder %s35_s25, %s692_s28  ;;  %p698_p2 = scmp.lt.s32.totalorder %s692_s28, %s692_s28 }
   0x9   :  { %p699_p3 = por %p698_p2, %p697_p1 }
   0xb   :  { %p700_p4 = pnand %p699_p3, %p693_p0 }
   0xd   :  { %703 = shalt.err (!%p700_p4)
}
   0xe   :  { %s836_s29 = smov 128   ;;  %s837_s30 = smov 8  }
   0xf   :  { %40 = dma.hbm_to_vmem [thread:$0]  %s936_s1, 256, %s35_s25, [#allocation6], %s836_s29, %s836_s29, %s837_s30  }
  0x10   :  { %s712_s10 = scalar_lea.vmem %s59_s27, 6144  ;;  %p717_p6 = scmp.lt.s32.totalorder %s59_s27, %s59_s27 }
  0x11   :  { %p713_p5 = scmp.ne.s32.totalorder %s59_s27, %s712_s10  ;;  %p718_p7 = scmp.lt.s32.totalorder %s712_s10, %s712_s10 }
  0x13   :  { %p719_p8 = por %p718_p7, %p717_p6 }
  0x15   :  { %p720_p9 = pnand %p719_p8, %p713_p5 }
  0x17   :  { %723 = shalt.err (!%p720_p9)
}
  0x18   :  { %s838_s11 = smov 384   ;;  %s839_s12 = smov 24  }
  0x19   :  { %64 = dma.hbm_to_vmem [thread:$0]  %s938_s3, 6144, %s59_s27, [#allocation9], %s838_s11, %s838_s11, %s839_s12  }
  0x1a   :  { %s840_s15 = smov [#allocation2]   ;;  %s841_s17 = smov [#allocation7]  }
  0x1b   :  { %s22_s16 = sshll.u32 %s840_s15, 4  ;;  %s46_s18 = sshll.u32 %s841_s17, 4  ;;  %s23_s16 = int_to_ptr.vmem [resolvable:$true] %s22_s16  ;;  %s47_s18 = int_to_ptr.vmem [resolvable:$true] %s46_s18 }
  0x1c   :  { %s732_s1 = scalar_lea.vmem %s23_s16, 256  ;;  %p737_p11 = scmp.lt.s32.totalorder %s23_s16, %s23_s16 }
  0x1d   :  { %p733_p10 = scmp.ne.s32.totalorder %s23_s16, %s732_s1  ;;  %p738_p12 = scmp.lt.s32.totalorder %s732_s1, %s732_s1 }
  0x1f   :  { %p739_p13 = por %p738_p12, %p737_p11 }
  0x21   :  { %p740_p0 = pnand %p739_p13, %p733_p10 }
  0x23   :  { %743 = shalt.err (!%p740_p0)
}
  0x24   :  { %28 = dma.hbm_to_vmem [thread:$0]  %s935_s0, 256, %s23_s16, [#allocation3], %s836_s29, %s836_s29, %s837_s30  }
  0x25   :  { %s752_s3 = scalar_lea.vmem %s47_s18, 256  ;;  %p757_p2 = scmp.lt.s32.totalorder %s47_s18, %s47_s18 }
  0x26   :  { %p753_p1 = scmp.ne.s32.totalorder %s47_s18, %s752_s3  ;;  %p758_p3 = scmp.lt.s32.totalorder %s752_s3, %s752_s3 }
  0x28   :  { %p759_p4 = por %p758_p3, %p757_p2 }
  0x2a   :  { %p760_p5 = pnand %p759_p4, %p753_p1 }
  0x2c   :  { %763 = shalt.err (!%p760_p5)
}
  0x2d   :  { %52 = dma.hbm_to_vmem [thread:$0]  %s937_s2, 256, %s47_s18, [#allocation6], %s836_s29, %s836_s29, %s837_s30  }
  0x2e   :  { %s842_s23 = smov [#allocation10]  }
  0x2f   :  { %s70_s24 = sshll.u32 %s842_s23, 4  ;;  %s71_s24 = int_to_ptr.vmem [resolvable:$true] %s70_s24 }
  0x30   :  { %s772_s25 = scalar_lea.vmem %s71_s24, 4096  ;;  %p777_p7 = scmp.lt.s32.totalorder %s71_s24, %s71_s24 }
  0x31   :  { %p773_p6 = scmp.ne.s32.totalorder %s71_s24, %s772_s25  ;;  %p778_p8 = scmp.lt.s32.totalorder %s772_s25, %s772_s25 }
  0x33   :  { %p779_p9 = por %p778_p8, %p777_p7 }
  0x35   :  { %p780_p10 = pnand %p779_p9, %p773_p6 }
  0x37   :  { %783 = shalt.err (!%p780_p10)
}
  0x38   :  { %s843_s0 = smov 256   ;;  %s844_s26 = smov 16  }
  0x39   :  { %76 = dma.hbm_to_vmem [thread:$0]  %s939_s4, 4096, %s71_s24, [#allocation9], %s843_s0, %s843_s0, %s844_s26  }
  0x3a   :  { %s845_s8 = smov [#allocation11]  }
  0x3b   :  { %s82_s9 = sshll.u32 %s845_s8, 4  ;;  %s83_s9 = int_to_ptr.vmem [resolvable:$true] %s82_s9 }
  0x3c   :  { %s792_s2 = scalar_lea.vmem %s83_s9, 2048  ;;  %p797_p12 = scmp.lt.s32.totalorder %s83_s9, %s83_s9 }
  0x3d   :  { %p793_p11 = scmp.ne.s32.totalorder %s83_s9, %s792_s2  ;;  %p798_p13 = scmp.lt.s32.totalorder %s792_s2, %s792_s2 }
  0x3f   :  { %p799_p0 = por %p798_p13, %p797_p12 }
  0x41   :  { %p800_p1 = pnand %p799_p0, %p793_p11 }
  0x43   :  { %803 = shalt.err (!%p800_p1)
}
  0x44   :  { %88 = dma.hbm_to_vmem [thread:$0]  %s940_s5, 2048, %s83_s9, [#allocation12], %s836_s29, %s836_s29, %s837_s30  }
  0x45   :  { %824 = dma.done.wait [#allocation3], 256  }
  0x46   :  { %825 = vsyncadd [#allocation3], 4294967040 }
  0x47   :  { %826 = dma.done.wait [#allocation6], 512  }
  0x48   :  { %827 = vsyncadd [#allocation6], 4294966784 }
  0x49   :  { %828 = dma.done.wait [#allocation9], 10240  }
  0x4a   :  { %829 = vsyncadd [#allocation9], 4294957056 }
  0x4b   :  { %830 = dma.done.wait [#allocation12], 2048  }
  0x4c   :  { %831 = vsyncadd [#allocation12], 4294965248  ;;  %v846_v0 = vmov 0.0   ;;  %v157_v1 = vld [vmem:[#allocation8 + $0x170] sm:$0xff]  ;;  %v156_v2 = vld [vmem:[#allocation8 + $0x168] sm:$0xff] }
  0x4d   :  { %240 = vmatprep.mubr.f32.mxu0 %v846_v0  ;;  %v154_v3 = vld [vmem:[#allocation8 + $0x158] sm:$0xff]  ;;  %176 = vmatprep.subr.mxu0 %v157_v1  ;;  %v153_v5 = vld [vmem:[#allocation8 + $0x150] sm:$0xff]  ;;  %v151_v6 = vld [vmem:[#allocation8 + $0x140] sm:$0xff] }
  0x4e   :  { %v158_v4 = vld [vmem:[#allocation8 + $0x178] sm:$0xff]  ;;  %177 = vmatpush1.msra.mxu0 %v156_v2  ;;  %v155_v7 = vld [vmem:[#allocation8 + $0x160] sm:$0xff]  ;;  %v152_v9 = vld [vmem:[#allocation8 + $0x148] sm:$0xff] }
  0x4f   :  { %600 = vmatprep.subr.mxu1 %v158_v4  ;;  %178 = vmatprep.subr.mxu0 %v154_v3  ;;  %v150_v8 = vld [vmem:[#allocation8 + $0x138] sm:$0xff]  ;;  %v148_v10 = vld [vmem:[#allocation8 + $0x128] sm:$0xff]  ;;  %v147_v11 = vld [vmem:[#allocation8 + $0x120] sm:$0xff] }
  0x50   :  { %601 = vmatpush3.msra.mxu1 %v158_v4  ;;  %179 = vmatpush1.msra.mxu0 %v153_v5  ;;  %v149_v12 = vld [vmem:[#allocation8 + $0x130] sm:$0xff]  ;;  %v144_v14 = vld [vmem:[#allocation8 + $0x108] sm:$0xff]  ;;  %v146_v15 = vld [vmem:[#allocation8 + $0x118] sm:$0xff] }
  0x51   :  { %602 = vmatprep.subr.mxu1 %v155_v7  ;;  %180 = vmatprep.subr.mxu0 %v151_v6  ;;  %v145_v13 = vld [vmem:[#allocation8 + $0x110] sm:$0xff]  ;;  %v142_v16 = vld [vmem:[#allocation8 + $0xf8] sm:$0xff]  ;;  %v143_v18 = vld [vmem:[#allocation8 + $0x100] sm:$0xff] }
  0x52   :  { %603 = vmatpush3.msra.mxu1 %v155_v7  ;;  %181 = vmatpush1.msra.mxu0 %v150_v8  ;;  %v141_v17 = vld [vmem:[#allocation8 + $0xf0] sm:$0xff]  ;;  %v139_v19 = vld [vmem:[#allocation8 + $0xe0] sm:$0xff]  ;;  %v138_v20 = vld [vmem:[#allocation8 + $0xd8] sm:$0xff] }
  0x53   :  { %604 = vmatprep.subr.mxu1 %v152_v9  ;;  %182 = vmatprep.subr.mxu0 %v148_v10  ;;  %v140_v21 = vld [vmem:[#allocation8 + $0xe8] sm:$0xff]  ;;  %v135_v23 = vld [vmem:[#allocation8 + $0xc0] sm:$0xff]  ;;  %v137_v24 = vld [vmem:[#allocation8 + $0xd0] sm:$0xff] }
  0x54   :  { %605 = vmatpush3.msra.mxu1 %v152_v9  ;;  %183 = vmatpush1.msra.mxu0 %v147_v11  ;;  %v136_v22 = vld [vmem:[#allocation8 + $0xc8] sm:$0xff]  ;;  %v133_v25 = vld [vmem:[#allocation8 + $0xb0] sm:$0xff]  ;;  %v134_v27 = vld [vmem:[#allocation8 + $0xb8] sm:$0xff] }
  0x55   :  { %606 = vmatprep.subr.mxu1 %v149_v12  ;;  %184 = vmatprep.subr.mxu0 %v145_v13  ;;  %v132_v26 = vld [vmem:[#allocation8 + $0xa8] sm:$0xff]  ;;  %v130_v28 = vld [vmem:[#allocation8 + $0x98] sm:$0xff]  ;;  %v129_v29 = vld [vmem:[#allocation8 + $0x90] sm:$0xff] }
  0x56   :  { %607 = vmatpush3.msra.mxu1 %v149_v12  ;;  %185 = vmatpush1.msra.mxu0 %v144_v14  ;;  %v131_v30 = vld [vmem:[#allocation8 + $0xa0] sm:$0xff]  ;;  %v126_v32 = vld [vmem:[#allocation8 + $0x78] sm:$0xff]  ;;  %v128_v33 = vld [vmem:[#allocation8 + $0x88] sm:$0xff] }
  0x57   :  { %608 = vmatprep.subr.mxu1 %v146_v15  ;;  %186 = vmatprep.subr.mxu0 %v142_v16  ;;  %v127_v31 = vld [vmem:[#allocation8 + $0x80] sm:$0xff]  ;;  %v124_v34 = vld [vmem:[#allocation8 + $0x68] sm:$0xff]  ;;  %v125_v36 = vld [vmem:[#allocation8 + $0x70] sm:$0xff] }
  0x58   :  { %609 = vmatpush3.msra.mxu1 %v146_v15  ;;  %187 = vmatpush1.msra.mxu0 %v141_v17  ;;  %v123_v35 = vld [vmem:[#allocation8 + $0x60] sm:$0xff]  ;;  %v121_v37 = vld [vmem:[#allocation8 + $0x50] sm:$0xff]  ;;  %v120_v38 = vld [vmem:[#allocation8 + $0x48] sm:$0xff] }
  0x59   :  { %610 = vmatprep.subr.mxu1 %v143_v18  ;;  %188 = vmatprep.subr.mxu0 %v139_v19  ;;  %v122_v39 = vld [vmem:[#allocation8 + $0x58] sm:$0xff]  ;;  %v117_v41 = vld [vmem:[#allocation8 + $0x30] sm:$0xff]  ;;  %v119_v42 = vld [vmem:[#allocation8 + $0x40] sm:$0xff] }
  0x5a   :  { %611 = vmatpush3.msra.mxu1 %v143_v18  ;;  %189 = vmatpush1.msra.mxu0 %v138_v20  ;;  %v118_v40 = vld [vmem:[#allocation8 + $0x38] sm:$0xff]  ;;  %v115_v43 = vld [vmem:[#allocation8 + $0x20] sm:$0xff]  ;;  %v116_v45 = vld [vmem:[#allocation8 + $0x28] sm:$0xff] }
  0x5b   :  { %612 = vmatprep.subr.mxu1 %v140_v21  ;;  %190 = vmatprep.subr.mxu0 %v136_v22  ;;  %v114_v44 = vld [vmem:[#allocation8 + $0x18] sm:$0xff]  ;;  %v112_v46 = vld [vmem:[#allocation8 + $0x8] sm:$0xff]  ;;  %v111_v47 = vld [vmem:[#allocation8] sm:$0xff] }
  0x5c   :  { %613 = vmatpush3.msra.mxu1 %v140_v21  ;;  %191 = vmatpush1.msra.mxu0 %v135_v23  ;;  %v113_v48 = vld [vmem:[#allocation8 + $0x10] sm:$0xff]  ;;  %v361_v50 = vld [vmem:[#allocation10 + $0xf8] sm:$0xff]  ;;  %v359_v52 = vld [vmem:[#allocation10 + $0xe8] sm:$0xff] }
  0x5d   :  { %614 = vmatprep.subr.mxu1 %v137_v24  ;;  %192 = vmatprep.subr.mxu0 %v133_v25  ;;  %v109_v49 = vld [vmem:[#allocation2] sm:$0xff]  ;;  %v456_v53 = vld [vmem:[#allocation11 + $0x78] sm:$0xff]  ;;  %v358_v55 = vld [vmem:[#allocation10 + $0xe0] sm:$0xff] }
  0x5e   :  { %615 = vmatpush3.msra.mxu1 %v137_v24  ;;  %193 = vmatpush1.msra.mxu0 %v132_v26  ;;  %v360_v51 = vld [vmem:[#allocation10 + $0xf0] sm:$0xff]  ;;  %v919_v54 = vld [vmem:[#allocation2 + $0x8] sm:$0xff]  ;;  %v355_v59 = vld [vmem:[#allocation10 + $0xc8] sm:$0xff] }
  0x5f   :  { %616 = vmatprep.subr.mxu1 %v134_v27  ;;  %194 = vmatprep.subr.mxu0 %v130_v28  ;;  %v357_v56 = vld [vmem:[#allocation10 + $0xd8] sm:$0xff]  ;;  %v455_v57 = vld [vmem:[#allocation11 + $0x70] sm:$0xff]  ;;  %v454_v60 = vld [vmem:[#allocation11 + $0x68] sm:$0xff] }
  0x60   :  { %617 = vmatpush3.msra.mxu1 %v134_v27  ;;  %195 = vmatpush1.msra.mxu0 %v129_v29  ;;  %v356_v58 = vld [vmem:[#allocation10 + $0xd0] sm:$0xff]  ;;  %v354_v61 = vld [vmem:[#allocation10 + $0xc0] sm:$0xff]  ;;  %v353_v62 = vld [vmem:[#allocation10 + $0xb8] sm:$0xff] }
  0x61   :  { %618 = vmatprep.subr.mxu1 %v131_v30  ;;  %196 = vmatprep.subr.mxu0 %v127_v31  ;;  %v453_v63 = vld [vmem:[#allocation11 + $0x60] sm:$0xff]  ;;  %v352_v1 = vld [vmem:[#allocation10 + $0xb0] sm:$0xff]  ;;  %v351_v2 = vld [vmem:[#allocation10 + $0xa8] sm:$0xff] }
  0x62   :  { %619 = vmatpush3.msra.mxu1 %v131_v30  ;;  %197 = vmatpush1.msra.mxu0 %v126_v32  ;;  %v452_v3 = vld [vmem:[#allocation11 + $0x58] sm:$0xff]  ;;  %v350_v4 = vld [vmem:[#allocation10 + $0xa0] sm:$0xff]  ;;  %v451_v6 = vld [vmem:[#allocation11 + $0x50] sm:$0xff] }
  0x63   :  { %620 = vmatprep.subr.mxu1 %v128_v33  ;;  %198 = vmatprep.subr.mxu0 %v124_v34  ;;  %v349_v5 = vld [vmem:[#allocation10 + $0x98] sm:$0xff]  ;;  %v348_v7 = vld [vmem:[#allocation10 + $0x90] sm:$0xff]  ;;  %v347_v8 = vld [vmem:[#allocation10 + $0x88] sm:$0xff] }
  0x64   :  { %621 = vmatpush3.msra.mxu1 %v128_v33  ;;  %199 = vmatpush1.msra.mxu0 %v123_v35  ;;  %v450_v9 = vld [vmem:[#allocation11 + $0x48] sm:$0xff]  ;;  %v346_v10 = vld [vmem:[#allocation10 + $0x80] sm:$0xff]  ;;  %v345_v11 = vld [vmem:[#allocation10 + $0x78] sm:$0xff] }
  0x65   :  { %622 = vmatprep.subr.mxu1 %v125_v36  ;;  %200 = vmatprep.subr.mxu0 %v121_v37  ;;  %v449_v12 = vld [vmem:[#allocation11 + $0x40] sm:$0xff]  ;;  %v344_v13 = vld [vmem:[#allocation10 + $0x70] sm:$0xff]  ;;  %v343_v14 = vld [vmem:[#allocation10 + $0x68] sm:$0xff] }
  0x66   :  { %623 = vmatpush3.msra.mxu1 %v125_v36  ;;  %201 = vmatpush1.msra.mxu0 %v120_v38  ;;  %v448_v15 = vld [vmem:[#allocation11 + $0x38] sm:$0xff]  ;;  %v342_v16 = vld [vmem:[#allocation10 + $0x60] sm:$0xff]  ;;  %v447_v18 = vld [vmem:[#allocation11 + $0x30] sm:$0xff] }
  0x67   :  { %624 = vmatprep.subr.mxu1 %v122_v39  ;;  %202 = vmatprep.subr.mxu0 %v118_v40  ;;  %v341_v17 = vld [vmem:[#allocation10 + $0x58] sm:$0xff]  ;;  %v340_v19 = vld [vmem:[#allocation10 + $0x50] sm:$0xff]  ;;  %v339_v20 = vld [vmem:[#allocation10 + $0x48] sm:$0xff]  ;;  %v161_v40 = vlaneseq }
  0x68   :  { %625 = vmatpush3.msra.mxu1 %v122_v39  ;;  %203 = vmatpush1.msra.mxu0 %v117_v41  ;;  %v446_v21 = vld [vmem:[#allocation11 + $0x28] sm:$0xff]  ;;  %v338_v22 = vld [vmem:[#allocation10 + $0x40] sm:$0xff]  ;;  %v337_v23 = vld [vmem:[#allocation10 + $0x38] sm:$0xff] }
  0x69   :  { %626 = vmatprep.subr.mxu1 %v119_v42  ;;  %204 = vmatprep.subr.mxu0 %v115_v43  ;;  %v445_v24 = vld [vmem:[#allocation11 + $0x20] sm:$0xff]  ;;  %v336_v25 = vld [vmem:[#allocation10 + $0x30] sm:$0xff]  ;;  %v335_v26 = vld [vmem:[#allocation10 + $0x28] sm:$0xff]  ;;  %v162_v41 = vshrl.u32 %v161_v40, 7 }
  0x6a   :  { %627 = vmatpush3.msra.mxu1 %v119_v42  ;;  %205 = vmatpush1.msra.mxu0 %v114_v44  ;;  %v444_v27 = vld [vmem:[#allocation11 + $0x18] sm:$0xff]  ;;  %v334_v28 = vld [vmem:[#allocation10 + $0x20] sm:$0xff]  ;;  %v443_v30 = vld [vmem:[#allocation11 + $0x10] sm:$0xff] }
  0x6b   :  { %628 = vmatprep.subr.mxu1 %v116_v45  ;;  %206 = vmatprep.subr.mxu0 %v112_v46  ;;  %v333_v29 = vld [vmem:[#allocation10 + $0x18] sm:$0xff]  ;;  %v332_v31 = vld [vmem:[#allocation10 + $0x10] sm:$0xff]  ;;  %v331_v32 = vld [vmem:[#allocation10 + $0x8] sm:$0xff]  ;;  %v167_v43 = vsub.s32 1, %v162_v41  ;;  %v171_v46 = vsub.s32 2, %v162_v41 }
  0x6c   :  { %629 = vmatpush3.msra.mxu1 %v116_v45  ;;  %207 = vmatpush1.msra.mxu0 %v111_v47  ;;  %v442_v33 = vld [vmem:[#allocation11 + $0x8] sm:$0xff]  ;;  %v330_v34 = vld [vmem:[#allocation10] sm:$0xff]  ;;  %v439_v37 = vld [vmem:[#allocation7] sm:$0xff] }
  0x6d   :  { %630 = vmatprep.subr.mxu1 %v113_v48  ;;  %241 = vmatmul.mubr.f32.vlgmr.msra.gmra.mxu0 %v109_v49  ;;  %v328_v35 = vld [vmem:[#allocation5] sm:$0xff]  ;;  %v440_v38 = vld [vmem:[#allocation7 + $0x8] sm:$0xff]  ;;  %v329_v39 = vld [vmem:[#allocation5 + $0x8] sm:$0xff] }
  0x6e   :  { %362 = vmatprep.subr.mxu0 %v361_v50  ;;  %631 = vmatpush3.msra.mxu1 %v113_v48  ;;  %v441_v36 = vld [vmem:[#allocation11] sm:$0xff]  ;;  %v159_v45 = vld [vmem:[%s941_s6] sm:$0x7]  ;;  %s847_s6 = smov [#allocation13]  }
  0x6f   :  { %363 = vmatpush1.msra.mxu0 %v360_v51  ;;  %632 = vmatprep.mubr.f32.mxu1 %v109_v49  ;;  %v163_v49 = vsub.s32 0, %v162_v41  ;;  %v168_v50 = vrot.slane %v159_v45, %v167_v43  ;;  %v172_v51 = vrot.slane %v159_v45, %v171_v46  ;;  %s549_s12 = sshll.u32 %s847_s6, 4  ;;  %s550_s12 = int_to_ptr.vmem [resolvable:$true] %s549_s12 }
  0x70   :  { %364 = vmatprep.subr.mxu0 %v359_v52  ;;  %635 = vmatprep.subr.mxu1 %v456_v53  ;;  %s804_s13 = scalar_lea.vmem %s550_s12, 256  ;;  %p809_p3 = scmp.lt.s32.totalorder %s550_s12, %s550_s12 }
  0x71   :  { %633 = vmatmul.mubr.f32.vlgmr.msra.gmra.mxu1 %v919_v54  ;;  %365 = vmatpush1.msra.mxu0 %v358_v55  ;;  %p805_p2 = scmp.ne.s32.totalorder %s550_s12, %s804_s13  ;;  %p810_p4 = scmp.lt.s32.totalorder %s804_s13, %s804_s13 }
  0x72   :  { %636 = vmatpush3.msra.mxu1 %v456_v53  ;;  %366 = vmatprep.subr.mxu0 %v357_v56 }
  0x73   :  { %637 = vmatprep.subr.mxu1 %v455_v57  ;;  %367 = vmatpush1.msra.mxu0 %v356_v58  ;;  %p811_p5 = por %p810_p4, %p809_p3 }
  0x74   :  { %638 = vmatpush3.msra.mxu1 %v455_v57  ;;  %368 = vmatprep.subr.mxu0 %v355_v59 }
  0x75   :  { %639 = vmatprep.subr.mxu1 %v454_v60  ;;  %369 = vmatpush1.msra.mxu0 %v354_v61  ;;  %p812_p6 = pnand %p811_p5, %p805_p2 }
  0x76   :  { %640 = vmatpush3.msra.mxu1 %v454_v60  ;;  %370 = vmatprep.subr.mxu0 %v353_v62 }
  0x77   :  { %641 = vmatprep.subr.mxu1 %v453_v63  ;;  %371 = vmatpush1.msra.mxu0 %v352_v1 }
  0x78   :  { %642 = vmatpush3.msra.mxu1 %v453_v63  ;;  %372 = vmatprep.subr.mxu0 %v351_v2 }
  0x79   :  { %643 = vmatprep.subr.mxu1 %v452_v3  ;;  %373 = vmatpush1.msra.mxu0 %v350_v4 }
  0x7a   :  { %644 = vmatpush3.msra.mxu1 %v452_v3  ;;  %374 = vmatprep.subr.mxu0 %v349_v5 }
  0x7b   :  { %645 = vmatprep.subr.mxu1 %v451_v6  ;;  %375 = vmatpush1.msra.mxu0 %v348_v7 }
  0x7c   :  { %646 = vmatpush3.msra.mxu1 %v451_v6  ;;  %376 = vmatprep.subr.mxu0 %v347_v8 }
  0x7d   :  { %647 = vmatprep.subr.mxu1 %v450_v9  ;;  %377 = vmatpush1.msra.mxu0 %v346_v10 }
  0x7e   :  { %648 = vmatpush3.msra.mxu1 %v450_v9  ;;  %378 = vmatprep.subr.mxu0 %v345_v11 }
  0x7f   :  { %649 = vmatprep.subr.mxu1 %v449_v12  ;;  %379 = vmatpush1.msra.mxu0 %v344_v13 }
  0x80   :  { %650 = vmatpush3.msra.mxu1 %v449_v12  ;;  %380 = vmatprep.subr.mxu0 %v343_v14 }
  0x81   :  { %651 = vmatprep.subr.mxu1 %v448_v15  ;;  %381 = vmatpush1.msra.mxu0 %v342_v16 }
  0x82   :  { %652 = vmatpush3.msra.mxu1 %v448_v15  ;;  %382 = vmatprep.subr.mxu0 %v341_v17 }
  0x83   :  { %653 = vmatprep.subr.mxu1 %v447_v18  ;;  %383 = vmatpush1.msra.mxu0 %v340_v19 }
  0x84   :  { %654 = vmatpush3.msra.mxu1 %v447_v18  ;;  %384 = vmatprep.subr.mxu0 %v339_v20 }
  0x85   :  { %655 = vmatprep.subr.mxu1 %v446_v21  ;;  %385 = vmatpush1.msra.mxu0 %v338_v22 }
  0x86   :  { %656 = vmatpush3.msra.mxu1 %v446_v21  ;;  %386 = vmatprep.subr.mxu0 %v337_v23 }
  0x87   :  { %657 = vmatprep.subr.mxu1 %v445_v24  ;;  %246 = vmatprep.mubr.f32.mxu0 %v846_v0 }
  0x88   :  { %387 = vmatpush1.msra.mxu0 %v336_v25  ;;  %658 = vmatpush3.msra.mxu1 %v445_v24 }
  0x89   :  { %247 = vmatmul.mubr.f32.gmra.mxu0 %v919_v54  ;;  %388 = vmatprep.subr.mxu0 %v335_v26 }
  0x8a   :  { %659 = vmatprep.subr.mxu1 %v444_v27  ;;  %389 = vmatpush1.msra.mxu0 %v334_v28 }
  0x8b   :  { %660 = vmatpush3.msra.mxu1 %v444_v27  ;;  %390 = vmatprep.subr.mxu0 %v333_v29 }
  0x8c   :  { %661 = vmatprep.subr.mxu1 %v443_v30  ;;  %391 = vmatpush1.msra.mxu0 %v332_v31 }
  0x8d   :  { %662 = vmatpush3.msra.mxu1 %v443_v30  ;;  %392 = vmatprep.subr.mxu0 %v331_v32 }
  0x8e   :  { %663 = vmatprep.subr.mxu1 %v442_v33  ;;  %393 = vmatpush1.msra.mxu0 %v330_v34 }
  0x8f   :  { %426 = vmatprep.mubr.f32.mxu0 %v846_v0  ;;  %664 = vmatpush3.msra.mxu1 %v442_v33 }
  0x90   :  { %427 = vmatmul.mubr.f32.vlgmr.msra.gmra.mxu0 %v328_v35  ;;  %665 = vmatprep.subr.mxu1 %v441_v36 }
  0x91   :  { %667 = vmatprep.mubr.f32.mxu1 %v439_v37  ;;  %666 = vmatpush3.msra.mxu1 %v441_v36 }
  0x92   :  { %432 = vmatprep.mubr.f32.mxu0 %v846_v0  ;;  %668 = vmatmul.mubr.f32.vlgmr.msra.gmra.mxu1 %v440_v38  ;;  %v164_v0 = vrot.slane %v159_v45, %v163_v49 }
  0x94   :  { %433 = vmatmul.mubr.f32.gmra.mxu0 %v329_v39 }
 0x12d   :  { %v242_v42 = vpop.f32.mrf.mxu0 }
 0x12e   :  { %v243_v62 = vadd.f32 %v242_v42, %v164_v0 }
 0x12f   :  { %v244_v44 = vpop.f32.mrf.mxu0 }
 0x130   :  { %v245_v54 = vadd.f32 %v244_v44, %v168_v50 }
 0x131   :  { %v634_v47 = vpop.f32.mrf.mxu1 }
 0x132   :  { %v325_v1 = vadd.f32 %v634_v47, %v172_v51 }
 0x133   :  { %v319_v52 = vpop.f32.mrf.mxu1 }
 0x134   :  { %v320_v56 = vadd.f32 %v319_v52, %v172_v51 }
 0x149   :  { %v248_v48 = vpop.f32.mrf.mxu0 }
 0x14a   :  { %v249_v7 = vadd.f32 %v248_v48, %v164_v0 }
 0x14b   :  { %v250_v53 = vpop.f32.mrf.mxu0 }
 0x14c   :  { %v251_v59 = vadd.f32 %v250_v53, %v168_v50 }
 0x150   :  { %v428_v55 = vpop.f32.mrf.mxu0 }
 0x151   :  { %v532_v57 = vadd.f32 %v428_v55, %v245_v54 }
 0x152   :  { %v430_v58 = vpop.f32.mrf.mxu0  ;;  %v669_v61 = vpop.f32.mrf.mxu1 }
 0x153   :  { %v534_v60 = vadd.f32 %v430_v58, %v320_v56  ;;  %v538_v4 = vmax.f32 %v243_v62, %v532_v57 }
 0x154   :  { %v434_v63 = vpop.f32.mrf.mxu0  ;;  %v523_v3 = vpop.f32.mrf.mxu1 }
 0x155   :  { %v533_v2 = vadd.f32 %v434_v63, %v251_v59  ;;  %v536_v5 = vadd.f32 %v534_v60, %v523_v3 }
 0x156   :  { %v436_v6 = vpop.f32.mrf.mxu0 }
 0x157   :  { %v535_v8 = vadd.f32 %v436_v6, %v325_v1  ;;  %v540_v9 = vmax.f32 %v538_v4, %v536_v5  ;;  %v539_v10 = vmax.f32 %v249_v7, %v533_v2 }
 0x159   :  { %v537_v11 = vadd.f32 %v669_v61, %v535_v8  ;;  %542 = vst [vmem:[#allocation13] sm:$0xff] %v540_v9 }
 0x15b   :  { %v541_v12 = vmax.f32 %v539_v10, %v537_v11 }
 0x15d   :  { %543 = vst [vmem:[#allocation13 + $0x8] sm:$0xff] %v541_v12 }
 0x15e   :  { %815 = shalt.err (!%p812_p6)
}
 0x15f   :  { %555 = dma.vmem_to_hbm [thread:$0]  %s550_s12, 256, %s942_s7, [#allocation4], %s836_s29, %s836_s29, %s837_s30  }
 0x160   :  { %832 = dma.done.wait [#allocation4], 256  }
 0x161   :  { %833 = vsyncadd [#allocation4], 4294967040 }
 0x162   :  { %559 = vsyncpa [#allocation3], 1 }
 0x163   :  { %560 = vsyncpa [#allocation6], 1 }
 0x164   :  { %561 = vsyncpa [#allocation9], 1 }
 0x165   :  { %562 = vsyncpa [#allocation12], 1 }
 0x166   :  { %563 = vsyncpa [#allocation4], 1 }

</bundles_post_ra>
